<compile_context>
chip_gen: v5e
topology: v5e:2x2
jax: 0.10.0
libtpu: 0.0.40
codegen_flags: <defaults>
</compile_context>

<pallas_src>
import functools
import math
from dataclasses import dataclass

import jax
import jax.numpy as jnp
from jax import lax
from jax.experimental import pallas as pl
from jax.experimental.pallas import tpu as pltpu

_VMEM_LIMIT = 48 * 1024 * 1024   # fits v7x (64 MiB physical) and raises v5e's 16 MiB default
_ROW_TILE = 256                  # multiple of 8; ~MBs per block at real T5 widths
_HIGHEST = lax.Precision.HIGHEST


def _row_tile(rows: int, row_tile: int = _ROW_TILE) -> int:
    return rows if rows <= row_tile else row_tile


# ---------------------------------------------------------------------------
# Kernel 1: T5 RMS norm  (T5LayerNorm: x * rsqrt(mean(x^2) + eps) * weight)
# ---------------------------------------------------------------------------
def _rms_norm_kernel(x_ref, w_ref, o_ref, *, eps):
    x = x_ref[...].astype(jnp.float32)
    var = jnp.mean(x * x, axis=-1, keepdims=True)
    y = x * lax.rsqrt(var + eps)
    o_ref[...] = (y * w_ref[...]).astype(o_ref.dtype)


def rms_norm_pallas(x2d, weight, eps):
    rows, d = x2d.shape
    tm = _row_tile(rows)
    grid = (pl.cdiv(rows, tm),)
    return pl.pallas_call(
        functools.partial(_rms_norm_kernel, eps=eps),
        out_shape=jax.ShapeDtypeStruct((rows, d), x2d.dtype),
        grid=grid,
        in_specs=[
            pl.BlockSpec((tm, d), lambda i: (i, 0)),
            pl.BlockSpec((1, d), lambda i: (0, 0)),
        ],
        out_specs=pl.BlockSpec((tm, d), lambda i: (i, 0)),
        compiler_params=pltpu.CompilerParams(
            dimension_semantics=("parallel",),
            vmem_limit_bytes=_VMEM_LIMIT,
        ),
    )(x2d, weight.reshape(1, d))


# ---------------------------------------------------------------------------
# Kernel 2: fused linear  y = act(x @ W + b);  y = LN(y);  y = y + residual
# (each epilogue stage optional; order = bias -> activation -> LN -> residual)
# ---------------------------------------------------------------------------
def _fused_linear_kernel(*refs, activation, has_bias, has_ln, has_res, ln_eps):
    refs = list(refs)
    x_ref = refs.pop(0)
    w_ref = refs.pop(0)
    b_ref = refs.pop(0) if has_bias else None
    if has_ln:
        lnw_ref = refs.pop(0)
        lnb_ref = refs.pop(0)
    res_ref = refs.pop(0) if has_res else None
    o_ref = refs.pop(0)

    y = jnp.dot(x_ref[...], w_ref[...], preferred_element_type=jnp.float32)
    if has_bias:
        y = y + b_ref[...]
    if activation == "relu":
        y = jnp.maximum(y, 0.0)
    elif activation == "gelu_new":
        c = math.sqrt(2.0 / math.pi)
        y = 0.5 * y * (1.0 + jnp.tanh(c * (y + 0.044715 * (y * y * y))))
    if has_ln:
        mean = jnp.mean(y, axis=-1, keepdims=True)
        var = jnp.mean((y - mean) * (y - mean), axis=-1, keepdims=True)
        y = (y - mean) * lax.rsqrt(var + ln_eps)
        y = y * lnw_ref[...] + lnb_ref[...]
    if has_res:
        y = y + res_ref[...]
    o_ref[...] = y.astype(o_ref.dtype)


def fused_linear_pallas(x2d, w, *, bias=None, activation=None, residual=None,
                        ln_weight=None, ln_bias=None, ln_eps=1e-5):
    rows, k = x2d.shape
    k2, n = w.shape
    assert k == k2
    tm = _row_tile(rows)
    grid = (pl.cdiv(rows, tm),)

    in_specs = [
        pl.BlockSpec((tm, k), lambda i: (i, 0)),
        pl.BlockSpec((k, n), lambda i: (0, 0)),   # weight resident across grid
    ]
    args = [x2d, w]
    if bias is not None:
        in_specs.append(pl.BlockSpec((1, n), lambda i: (0, 0)))
        args.append(bias.reshape(1, n))
    has_ln = ln_weight is not None
    if has_ln:
        in_specs.append(pl.BlockSpec((1, n), lambda i: (0, 0)))
        args.append(ln_weight.reshape(1, n))
        in_specs.append(pl.BlockSpec((1, n), lambda i: (0, 0)))
        args.append(ln_bias.reshape(1, n))
    if residual is not None:
        in_specs.append(pl.BlockSpec((tm, n), lambda i: (i, 0)))
        args.append(residual)

    kernel = functools.partial(
        _fused_linear_kernel,
        activation=activation,
        has_bias=bias is not None,
        has_ln=has_ln,
        has_res=residual is not None,
        ln_eps=ln_eps,
    )
    return pl.pallas_call(
        kernel,
        out_shape=jax.ShapeDtypeStruct((rows, n), x2d.dtype),
        grid=grid,
        in_specs=in_specs,
        out_specs=pl.BlockSpec((tm, n), lambda i: (i, 0)),
        compiler_params=pltpu.CompilerParams(
            dimension_semantics=("parallel",),
            vmem_limit_bytes=_VMEM_LIMIT,
        ),
    )(*args)


# ---------------------------------------------------------------------------
# Kernel 3: attention core per (batch, head):  softmax(q k^T + bias) v
# (T5 does NOT scale scores by 1/sqrt(d_kv))
# TODO(synk): for long sequences, replace with a flash-style kv-tiled kernel.
# ---------------------------------------------------------------------------
def _attention_kernel(q_ref, k_ref, v_ref, b_ref, o_ref):
    q = q_ref[0].astype(jnp.float32)
    k = k_ref[0].astype(jnp.float32)
    v = v_ref[0].astype(jnp.float32)
    scores = lax.dot_general(q, k, (((1,), (1,)), ((), ())),
                             preferred_element_type=jnp.float32)
    scores = scores + b_ref[0]
    m = jnp.max(scores, axis=-1, keepdims=True)
    e = jnp.exp(scores - m)
    p = e / jnp.sum(e, axis=-1, keepdims=True)
    ctx = lax.dot_general(p, v, (((1,), (0,)), ((), ())),
                          preferred_element_type=jnp.float32)
    o_ref[0] = ctx.astype(o_ref.dtype)


def attention_pallas(q, k, v, bias):
    bh, sq, d = q.shape
    sk = k.shape[1]
    return pl.pallas_call(
        _attention_kernel,
        out_shape=jax.ShapeDtypeStruct((bh, sq, d), q.dtype),
        grid=(bh,),
        in_specs=[
            pl.BlockSpec((1, sq, d), lambda i: (i, 0, 0)),
            pl.BlockSpec((1, sk, d), lambda i: (i, 0, 0)),
            pl.BlockSpec((1, sk, d), lambda i: (i, 0, 0)),
            pl.BlockSpec((1, sq, sk), lambda i: (i, 0, 0)),
        ],
        out_specs=pl.BlockSpec((1, sq, d), lambda i: (i, 0, 0)),
        compiler_params=pltpu.CompilerParams(
            dimension_semantics=("parallel",),
            vmem_limit_bytes=_VMEM_LIMIT,
        ),
    )(q, k, v, bias)


# ---------------------------------------------------------------------------
# Relative position bias (T5 compute_bias) — embedding gather kept in plain JAX.
# ---------------------------------------------------------------------------
def _relative_position_bucket(relative_position, bidirectional, num_buckets,
                              max_distance=128):
    relative_buckets = jnp.zeros_like(relative_position)
    if bidirectional:
        num_buckets //= 2
        relative_buckets += (relative_position > 0).astype(jnp.int32) * num_buckets
        relative_position = jnp.abs(relative_position)
    else:
        relative_position = -jnp.minimum(relative_position, 0)
    max_exact = num_buckets // 2
    is_small = relative_position < max_exact
    rel_if_large = max_exact + (
        jnp.log(relative_position.astype(jnp.float32) / max_exact)
        / math.log(max_distance / max_exact)
        * (num_buckets - max_exact)
    ).astype(jnp.int32)
    rel_if_large = jnp.minimum(rel_if_large, num_buckets - 1)
    return relative_buckets + jnp.where(is_small, relative_position, rel_if_large)


def compute_position_bias(rel_emb, qlen, klen, *, bidirectional, num_buckets):
    context_position = jnp.arange(qlen, dtype=jnp.int32)[:, None]
    memory_position = jnp.arange(klen, dtype=jnp.int32)[None, :]
    relative_position = memory_position - context_position
    rp_bucket = _relative_position_bucket(relative_position, bidirectional, num_buckets)
    values = rel_emb[rp_bucket]                     # (qlen, klen, H)
    return jnp.transpose(values, (2, 0, 1))[None]   # (1, H, qlen, klen)


# ---------------------------------------------------------------------------
# Config + parameters
# ---------------------------------------------------------------------------
@dataclass
class T5Config:
    d_model: int = 32
    d_kv: int = 8
    num_heads: int = 4
    d_ff: int = 64
    layer_norm_epsilon: float = 1e-6
    relative_attention_num_buckets: int = 32
    is_decoder: bool = True
    has_relative_attention_bias: bool = True
    skip_adapter_layer: bool = False
    skip_vqg_adapter_layer: bool = False


def init_params(key, cfg):
    # Linear weights stored as (in_features, out_features) == torch weight.T
    d, h, dk, f = cfg.d_model, cfg.num_heads, cfg.d_kv, cfg.d_ff
    inner, down = h * dk, d // 2
    it = iter(jax.random.split(key, 32))

    def w(shape, scale=0.1):
        return (scale * jax.random.normal(next(it), shape)).astype(jnp.float32)

    def attn_params():
        return {"ln": (1.0 + w((d,), 0.02)),
                "q": w((d, inner)), "k": w((d, inner)),
                "v": w((d, inner)), "o": w((inner, d))}

    params = {"sa": attn_params(), "ca": attn_params(),
              "ff": {"ln": (1.0 + w((d,), 0.02)),
                     "wi": w((d, f)), "wo": w((f, d))}}
    params["sa"]["rel"] = w((cfg.relative_attention_num_buckets, h), 0.5)

    def adapter_params():
        return {"dw": w((d, down)), "db": w((down,), 0.02),
                "uw": w((down, d)), "ub": w((d,), 0.02),
                "ln_w": (1.0 + w((d,), 0.02)), "ln_b": w((d,), 0.02)}

    params["adapter"] = adapter_params()
    params["vqg_adapter"] = adapter_params()
    return params


# ---------------------------------------------------------------------------
# T5_Block forward (Pallas kernels)
# ---------------------------------------------------------------------------
def t5_block_pallas(params, cfg, hidden_states, attention_mask=None,
                    encoder_hidden_states=None, encoder_attention_mask=None):
    # TODO(synk): past_key_value / use_cache incremental-decode path not implemented.
    eps = cfg.layer_norm_epsilon
    b, s, d = hidden_states.shape
    h, dk = cfg.num_heads, cfg.d_kv
    rows = b * s
    x2d = hidden_states.reshape(rows, d).astype(jnp.float32)

    def heads(t2d, sx):
        return t2d.reshape(b, sx, h, dk).transpose(0, 2, 1, 3).reshape(b * h, sx, dk)

    def unheads(t, sx):
        return t.reshape(b, h, sx, dk).transpose(0, 2, 1, 3).reshape(b * sx, h * dk)

    def attention_sublayer(x2d, p, bias4d, kv2d=None, s_kv=None):
        normed = rms_norm_pallas(x2d, p["ln"], eps)
        kv_src = normed if kv2d is None else kv2d
        s_kv = s if s_kv is None else s_kv
        q = fused_linear_pallas(normed, p["q"])
        k = fused_linear_pallas(kv_src, p["k"])
        v = fused_linear_pallas(kv_src, p["v"])
        bias = jnp.broadcast_to(bias4d.astype(jnp.float32),
                                (b, h, s, s_kv)).reshape(b * h, s, s_kv)
        ctx = attention_pallas(heads(q, s), heads(k, s_kv), heads(v, s_kv), bias)
        # output projection with fused residual add
        return fused_linear_pallas(unheads(ctx, s), p["o"], residual=x2d)

    # ---- T5LayerSelfAttention ----
    if cfg.has_relative_attention_bias:
        pos_bias = compute_position_bias(
            params["sa"]["rel"], s, s,
            bidirectional=not cfg.is_decoder,
            num_buckets=cfg.relative_attention_num_buckets)
    else:
        pos_bias = jnp.zeros((1, h, s, s), jnp.float32)
    if attention_mask is not None:
        pos_bias = pos_bias + attention_mask
    x2d = attention_sublayer(x2d, params["sa"], pos_bias)

    # ---- T5LayerCrossAttention (decoder only) ----
    if cfg.is_decoder and encoder_hidden_states is not None:
        s_enc = encoder_hidden_states.shape[1]
        enc2d = encoder_hidden_states.reshape(b * s_enc, d).astype(jnp.float32)
        cross_bias = jnp.zeros((1, h, s, s_enc), jnp.float32)
        if encoder_attention_mask is not None:
            cross_bias = cross_bias + encoder_attention_mask
        x2d = attention_sublayer(x2d, params["ca"], cross_bias,
                                 kv2d=enc2d, s_kv=s_enc)

    # ---- T5LayerFF (relu variant), relu fused into wi epilogue ----
    normed = rms_norm_pallas(x2d, params["ff"]["ln"], eps)
    ffh = fused_linear_pallas(normed, params["ff"]["wi"], activation="relu")
    x2d = fused_linear_pallas(ffh, params["ff"]["wo"], residual=x2d)

    # ---- Adapters: gelu_new, post-LayerNorm, residual added after LN ----
    def adapter(x2d, p):
        down = fused_linear_pallas(x2d, p["dw"], bias=p["db"], activation="gelu_new")
        return fused_linear_pallas(down, p["uw"], bias=p["ub"],
                                   ln_weight=p["ln_w"], ln_bias=p["ln_b"],
                                   ln_eps=1e-5, residual=x2d)

    if not cfg.skip_adapter_layer:
        x2d = adapter(x2d, params["adapter"])
    if not cfg.skip_vqg_adapter_layer:
        x2d = adapter(x2d, params["vqg_adapter"])

    return x2d.reshape(b, s, d)


# ---------------------------------------------------------------------------
# Pure-JAX reference (mirrors PyTorch eval-mode math) for correctness check
# ---------------------------------------------------------------------------
def _ref_rms_norm(x, w, eps):
    var = jnp.mean(x.astype(jnp.float32) ** 2, axis=-1, keepdims=True)
    return w * (x * lax.rsqrt(var + eps))


def _ref_layer_norm(x, w, bias, eps):
    mean = jnp.mean(x, axis=-1, keepdims=True)
    var = jnp.mean((x - mean) ** 2, axis=-1, keepdims=True)
    return (x - mean) * lax.rsqrt(var + eps) * w + bias


def _ref_gelu_new(x):
    c = math.sqrt(2.0 / math.pi)
    return 0.5 * x * (1.0 + jnp.tanh(c * (x + 0.044715 * x ** 3)))


def t5_block_reference(params, cfg, hidden_states, attention_mask=None,
                       encoder_hidden_states=None, encoder_attention_mask=None):
    eps = cfg.layer_norm_epsilon
    b, s, d = hidden_states.shape
    h, dk = cfg.num_heads, cfg.d_kv

    def proj(x, w):
        return jnp.einsum("...i,io->...o", x, w, precision=_HIGHEST)

    def mha(q_in, kv_in, p, bias):
        s_kv = kv_in.shape[1]
        q = proj(q_in, p["q"]).reshape(b, s, h, dk).transpose(0, 2, 1, 3)
        k = proj(kv_in, p["k"]).reshape(b, s_kv, h, dk).transpose(0, 2, 1, 3)
        v = proj(kv_in, p["v"]).reshape(b, s_kv, h, dk).transpose(0, 2, 1, 3)
        scores = jnp.einsum("bhqd,bhkd->bhqk", q, k, precision=_HIGHEST) + bias
        w_attn = jax.nn.softmax(scores.astype(jnp.float32), axis=-1)
        ctx = jnp.einsum("bhqk,bhkd->bhqd", w_attn, v, precision=_HIGHEST)
        ctx = ctx.transpose(0, 2, 1, 3).reshape(b, s, h * dk)
        return proj(ctx, p["o"])

    x = hidden_states.astype(jnp.float32)

    # self attention
    if cfg.has_relative_attention_bias:
        pos_bias = compute_position_bias(
            params["sa"]["rel"], s, s,
            bidirectional=not cfg.is_decoder,
            num_buckets=cfg.relative_attention_num_buckets)
    else:
        pos_bias = jnp.zeros((1, h, s, s), jnp.float32)
    if attention_mask is not None:
        pos_bias = pos_bias + attention_mask
    normed = _ref_rms_norm(x, params["sa"]["ln"], eps)
    x = x + mha(normed, normed, params["sa"], pos_bias)

    # cross attention
    if cfg.is_decoder and encoder_hidden_states is not None:
        s_enc = encoder_hidden_states.shape[1]
        cross_bias = jnp.zeros((1, h, s, s_enc), jnp.float32)
        if encoder_attention_mask is not None:
            cross_bias = cross_bias + encoder_attention_mask
        normed = _ref_rms_norm(x, params["ca"]["ln"], eps)
        x = x + mha(normed, encoder_hidden_states.astype(jnp.float32),
                    params["ca"], cross_bias)

    # feed-forward
    normed = _ref_rms_norm(x, params["ff"]["ln"], eps)
    ffh = jnp.maximum(proj(normed, params["ff"]["wi"]), 0.0)
    x = x + proj(ffh, params["ff"]["wo"])

    # adapters
    def adapter(x, p):
        down = _ref_gelu_new(proj(x, p["dw"]) + p["db"])
        up = proj(down, p["uw"]) + p["ub"]
        out = _ref_layer_norm(up, p["ln_w"], p["ln_b"], 1e-5)
        return out + x

    if not cfg.skip_adapter_layer:
        x = adapter(x, params["adapter"])
    if not cfg.skip_vqg_adapter_layer:
        x = adapter(x, params["vqg_adapter"])
    return x


# ---------------------------------------------------------------------------
if __name__ == "__main__":
    cfg = T5Config()
    key = jax.random.PRNGKey(0)
    k_params, k_x, k_enc = jax.random.split(key, 3)

    B, S, S_ENC = 2, 8, 16
    params = init_params(k_params, cfg)
    hidden = jax.random.normal(k_x, (B, S, cfg.d_model), jnp.float32)
    enc_hidden = jax.random.normal(k_enc, (B, S_ENC, cfg.d_model), jnp.float32)

    # HF-style extended additive masks (0 = keep, -1e9 = masked)
    pad = jnp.ones((B, S), jnp.float32).at[1, -2:].set(0.0)
    causal = jnp.tril(jnp.ones((S, S), jnp.float32))
    self_mask = (1.0 - causal[None, :, :] * pad[:, None, :])[:, None, :, :] * -1e9
    enc_pad = jnp.ones((B, S_ENC), jnp.float32).at[0, -3:].set(0.0)
    cross_mask = (1.0 - enc_pad)[:, None, None, :] * -1e9

    out = t5_block_pallas(params, cfg, hidden, self_mask, enc_hidden, cross_mask)
    out = jax.block_until_ready(out)
    ref = t5_block_reference(params, cfg, hidden, self_mask, enc_hidden, cross_mask)
    ref = jax.block_until_ready(ref)

    finite = bool(jnp.all(jnp.isfinite(out)))
    close = bool(jnp.allclose(out, ref, atol=2e-3, rtol=2e-3))
    if finite and close:
        print("KERNEL_OK")
    else:
        print("MISMATCH max_abs_err =", float(jnp.max(jnp.abs(out - ref))))
</pallas_src>

<mosaic_0001>
module attributes {stable_mosaic.version = 11 : i64} {
  func.func @_rms_norm_kernel(%arg0: i32, %arg1: memref<16x32xf32, #tpu.memory_space<vmem>>, %arg2: memref<1x32xf32, #tpu.memory_space<vmem>>, %arg3: memref<16x32xf32, #tpu.memory_space<vmem>>) attributes {dimension_semantics = [#tpu.dimension_semantics<parallel>], iteration_bounds = array<i64: 1>, scalar_prefetch = 0 : i64, scratch_operands = 0 : i64, tpu.core_type = #tpu.core_type<tc>, window_params = [{transform_indices = @transform_0, window_bounds = array<i64: 16, 32>}, {pipeline_mode = #tpu.pipeline_mode<synchronous>, transform_indices = @transform_1, window_bounds = array<i64: 1, 32>}, {transform_indices = @transform_2, window_bounds = array<i64: 16, 32>}]} {
    %c0 = arith.constant 0 : index
    %c0_0 = arith.constant 0 : index
    %0 = vector.load %arg1[%c0, %c0_0] : memref<16x32xf32, #tpu.memory_space<vmem>>, vector<16x32xf32>
    %1 = arith.mulf %0, %0 : vector<16x32xf32>
    %cst = arith.constant dense<0.000000e+00> : vector<16xf32>
    %2 = vector.multi_reduction <add>, %1, %cst [1] : vector<16x32xf32> to vector<16xf32>
    %3 = vector.shape_cast %2 : vector<16xf32> to vector<16x1xf32>
    %cst_1 = arith.constant 3.200000e+01 : f32
    %4 = vector.broadcast %cst_1 : f32 to vector<16x1xf32>
    %5 = arith.divf %3, %4 : vector<16x1xf32>
    %cst_2 = arith.constant 9.99999997E-7 : f32
    %6 = vector.broadcast %cst_2 : f32 to vector<16x1xf32>
    %7 = arith.addf %5, %6 : vector<16x1xf32>
    %8 = math.rsqrt %7 : vector<16x1xf32>
    %9 = vector.broadcast %8 : vector<16x1xf32> to vector<16x32xf32>
    %10 = arith.mulf %0, %9 : vector<16x32xf32>
    %c0_3 = arith.constant 0 : index
    %c0_4 = arith.constant 0 : index
    %11 = vector.load %arg2[%c0_3, %c0_4] : memref<1x32xf32, #tpu.memory_space<vmem>>, vector<1x32xf32>
    %12 = vector.broadcast %11 : vector<1x32xf32> to vector<16x32xf32>
    %13 = arith.mulf %10, %12 : vector<16x32xf32>
    %c0_5 = arith.constant 0 : index
    %c0_6 = arith.constant 0 : index
    %14 = vector.load %arg3[%c0_5, %c0_6] : memref<16x32xf32, #tpu.memory_space<vmem>>, vector<16x32xf32>
    tpu.vector_store %arg3[%c0_5, %c0_6], %13 {strides = array<i32>} : memref<16x32xf32, #tpu.memory_space<vmem>>, vector<16x32xf32>,
    return
  }
  func.func @transform_0(%arg0: i32) -> (i32, i32) {
    %c0_i32 = arith.constant 0 : i32
    %c0_i32_0 = arith.constant 0 : i32
    return %arg0, %c0_i32 : i32, i32
  }
  func.func @transform_1(%arg0: i32) -> (i32, i32) {
    %c0_i32 = arith.constant 0 : i32
    %c0_i32_0 = arith.constant 0 : i32
    %c0_i32_1 = arith.constant 0 : i32
    return %c0_i32, %c0_i32_0 : i32, i32
  }
  func.func @transform_2(%arg0: i32) -> (i32, i32) {
    %c0_i32 = arith.constant 0 : i32
    %c0_i32_0 = arith.constant 0 : i32
    return %arg0, %c0_i32 : i32, i32
  }
}

</mosaic_0001>

<bundles_post_ra>
// kernel: tpu_custom_call.1
= control target key start
LH: loop header
LB: loop body
LE: loop exit
PB: predicated region body
PF: predicated region fallthrough
CT: control target
= control target key end

     0   :  { %7 = vsyncpa [#allocation3], 0  ;;  %s245_s0 = inlined_call_operand.hbm [shape: f32[16,32], index: 0, kind: input, shape index: {}]   ;;  %s246_s1 = inlined_call_operand.hbm [shape: f32[1,32], index: 1, kind: input, shape index: {}]   ;;  %s247_s2 = inlined_call_operand.hbm [shape: f32[16,32], index: 2, kind: output, shape index: {}]  }
   0x1   :  { %8 = vsyncpa [#allocation6], 0 }
   0x2   :  { %9 = vsyncpa [#allocation4], 0  ;;  %s14_s11 = sshll.u32 %s245_s0, 4  ;;  %s205_s12 = smov [#allocation2]   ;;  %s15_s11 = int_to_ptr.hbm [resolvable:$true] %s14_s11 }
   0x3   :  { %s16_s13 = sshll.u32 %s205_s12, 4  ;;  %s28_s16 = sshll.u32 %s246_s1, 4  ;;  %s17_s13 = int_to_ptr.vmem [resolvable:$true] %s16_s13  ;;  %s29_s16 = int_to_ptr.hbm [resolvable:$true] %s28_s16 }
   0x4   :  { %s206_s17 = smov 128   ;;  %s207_s18 = smov 8  }
   0x5   :  { %22 = dma.hbm_to_vmem [thread:$0]  %s15_s11, 256, %s17_s13, [#allocation3], %s206_s17, %s206_s17, %s207_s18  }
   0x6   :  { %s208_s19 = smov [#allocation5]  }
   0x7   :  { %s30_s20 = sshll.u32 %s208_s19, 4  ;;  %s31_s20 = int_to_ptr.vmem [resolvable:$true] %s30_s20 }
   0x8   :  { %33 = dma.hbm_to_vmem [thread:$0]  %s29_s16, 16, %s31_s20, [#allocation6]  }
   0x9   :  { %199 = dma.done.wait [#allocation3], 256  }
   0xa   :  { %200 = vsyncadd [#allocation3], 4294967040 }
   0xb   :  { %201 = dma.done.wait [#allocation6], 16  }
   0xc   :  { %202 = vsyncadd [#allocation6], 4294967280  ;;  %v42_v0 = vld [vmem:[#allocation2] sm:$0xff]  ;;  %vm46_vm0 = vcmask 261120   ;;  %v43_v2 = vld [vmem:[#allocation2 + $0x8] sm:$0xff]  ;;  %v209_v6 = vmov 32.0  }
   0xd   :  { %v44_v1 = vmul.f32 %v42_v0, %v42_v0  ;;  %v45_v4 = vmul.f32 %v43_v2, %v43_v2  ;;  %121 = vrcp.f32 %v209_v6  ;;  %v120_v27 = vld [vmem:[#allocation5] ss:$0 sm:$0xff]  ;;  %s210_s0 = smov [#allocation7]   ;;  %s100_s23 = sshll.u32 %s247_s2, 4  ;;  %s101_s23 = int_to_ptr.hbm [resolvable:$true] %s100_s23 }
   0xe   :  { %s98_s1 = sshll.u32 %s210_s0, 4  ;;  %s99_s1 = int_to_ptr.vmem [resolvable:$true] %s98_s1 }
   0xf   :  { %v47_v3 = vsel %vm46_vm0, %v44_v1, 0.0  ;;  %v50_v5 = vsel %vm46_vm0, %v45_v4, 0.0 }
  0x10   :  { %48 = vadd.xlane.f32.xlu0 %v47_v3 }
  0x13   :  { %v122_v7 = vpop.eup %121 }
  0x14   :  { %v54_v8 = vmul.f32 32.0, %v122_v7  ;;  %vm58_vm1 = vweird.f32 %v122_v7 }
  0x16   :  { %v55_v9 = vsub.f32 1.0, %v54_v8 }
  0x18   :  { %51 = vadd.xlane.f32.xlu0 %v50_v5  ;;  %v56_v10 = vmul.f32 %v122_v7, %v55_v9 }
  0x1a   :  { %v57_v11 = vadd.f32 %v122_v7, %v56_v10 }
  0x1c   :  { %v59_v12 = vsel %vm58_vm1, %v122_v7, %v57_v11 }
  0x83   :  { %v49_v13 = vpop.xlane.xlu0 %48 }
  0x84   :  { %v60_v14 = vmul.f32 %v59_v12, %v49_v13 }
  0x86   :  { %v62_v15 = vadd.f32 1e-06, %v60_v14 }
  0x88   :  { %123 = vrsqrt.f32 %v62_v15  ;;  %vm70_vm3 = vweird.f32 %v62_v15 }
  0x8b   :  { %v52_v16 = vpop.xlane.xlu0 %51 }
  0x8c   :  { %v61_v17 = vmul.f32 %v59_v12, %v52_v16 }
  0x8e   :  { %v124_v18 = vpop.eup %123  ;;  %v63_v19 = vadd.f32 1e-06, %v61_v17 }
  0x8f   :  { %v65_v20 = vmul.f32 %v124_v18, %v62_v15  ;;  %vm71_vm2 = vweird.f32 %v124_v18 }
  0x90   :  { %125 = vrsqrt.f32 %v63_v19  ;;  %vm72_vm4 = vmor %vm70_vm3, %vm71_vm2  ;;  %vm80_vm6 = vweird.f32 %v63_v19 }
  0x91   :  { %v66_v21 = vmul.f32 %v124_v18, %v65_v20 }
  0x93   :  { %v67_v22 = vmul.f32 0.5, %v66_v21 }
  0x95   :  { %v68_v23 = vsub.f32 1.5, %v67_v22 }
  0x96   :  { %v126_v24 = vpop.eup %125 }
  0x97   :  { %v69_v25 = vmul.f32 %v124_v18, %v68_v23  ;;  %v75_v26 = vmul.f32 %v126_v24, %v63_v19  ;;  %vm81_vm5 = vweird.f32 %v126_v24 }
  0x98   :  { %vm82_vm7 = vmor %vm80_vm6, %vm81_vm5 }
  0x99   :  { %v73_v28 = vsel %vm72_vm4, %v124_v18, %v69_v25  ;;  %v76_v29 = vmul.f32 %v126_v24, %v75_v26 }
  0x9a   :  { %v84_v30 = vmul.f32 %v73_v28, %v42_v0 }
  0x9b   :  { %v77_v31 = vmul.f32 0.5, %v76_v29 }
  0x9c   :  { %v90_v32 = vmul.f32 %v120_v27, %v84_v30 }
  0x9d   :  { %v78_v33 = vsub.f32 1.5, %v77_v31 }
  0x9e   :  { %92 = vst.msk [vmem:[#allocation7] sm:$0xff] %vm46_vm0, %v90_v32 }
  0x9f   :  { %v79_v34 = vmul.f32 %v126_v24, %v78_v33 }
  0xa1   :  { %v83_v35 = vsel %vm82_vm7, %v126_v24, %v79_v34 }
  0xa2   :  { %v85_v36 = vmul.f32 %v83_v35, %v43_v2 }
  0xa4   :  { %v91_v37 = vmul.f32 %v120_v27, %v85_v36 }
  0xa6   :  { %93 = vst.msk [vmem:[#allocation7 + $0x8] sm:$0xff] %vm46_vm0, %v91_v37 }
  0xa7   :  { %106 = dma.vmem_to_hbm [thread:$0]  %s99_s1, 256, %s101_s23, [#allocation4], %s206_s17, %s206_s17, %s207_s18  }
  0xa8   :  { %203 = dma.done.wait [#allocation4], 256  }
  0xa9   :  { %204 = vsyncadd [#allocation4], 4294967040 }
  0xaa   :  { %111 = vsyncpa [#allocation3], 1 }
  0xab   :  { %112 = vsyncpa [#allocation6], 1 }
  0xac   :  { %113 = vsyncpa [#allocation4], 1 }

</bundles_post_ra>
